<compile_context>
chip_gen: v6e
topology: v6e:2x2x1
jax: 0.10.0
libtpu: 0.0.40
codegen_flags: <defaults>
</compile_context>

<pallas_src>
import jax
import jax.numpy as jnp
from jax.experimental import pallas as pl
from jax.experimental.pallas import tpu as pltpu  # noqa: F401  (kept for CompilerParams at larger shapes)


# --------------------------------------------------------------------------- #
# Kernel: fused T-step rollout of the MLP cell, single invocation (no grid).
# Refs (all whole-array, VMEM-resident):
#   h0_ref  : (B, L)     initial hidden
#   x_ref   : (T, B, I)  full input sequence
#   w1h_ref : (L, H)     layer-1 weight, hidden columns (already transposed)
#   w1x_ref : (I, H)     layer-1 weight, input columns  (already transposed)
#   b1_ref  : (1, H)     layer-1 bias
#   w2_ref  : (H, L)     layer-2 weight, pre-scaled by 0.1
#   b2_ref  : (1, L)     layer-2 bias,   pre-scaled by 0.1
#   h_ref   : (B, L)     final hidden (written exactly once)
# --------------------------------------------------------------------------- #
def mlpcell_fused_kernel(h0_ref, x_ref, w1h_ref, w1x_ref, b1_ref, w2_ref,
                         b2_ref, h_ref):
    # One-time loads: weights / bias broadcasts hoisted out of the time loop.
    w1h = w1h_ref[...]                      # (L, H)
    w1x = w1x_ref[...]                      # (I, H)
    b1 = b1_ref[...]                        # (1, H)
    w2 = w2_ref[...]                        # (H, L)  0.1 folded in
    b2 = b2_ref[...]                        # (1, L)  0.1 folded in

    T = x_ref.shape[0]                      # trace-time constant
    h = h0_ref[...]                         # (B, L) carried in vregs

    # Fully-unrolled static time loop (equivalent to lax.fori_loop unroll=True).
    # TODO(synk): for very large T, chunk x over a grid axis (block (Tc,B,I) per
    # step with an inner loop) to bound compile time / VMEM; unnecessary here.
    for t in range(T):
        x_t = x_ref[t]                      # (B, I)
        # Layer 1: split matmul == concat([h, x_t], dim=1) @ W1.T  (no concat)
        z1 = (jnp.dot(h, w1h, preferred_element_type=jnp.float32)
              + jnp.dot(x_t, w1x, preferred_element_type=jnp.float32)
              + b1)                                              # (B, H)
        a1 = jnp.maximum(z1, 0.0)                                # ReLU
        # Layer 2 (0.1 scale pre-folded into w2 / b2).
        vf = jnp.dot(a1, w2, preferred_element_type=jnp.float32) + b2  # (B, L)
        h = h + vf

    h_ref[...] = h                          # single HBM writeback


# --------------------------------------------------------------------------- #
# One-time parameter preparation (hoisted out of the per-call path).
# PyTorch Linear stores W as (out, in); the kernel wants (in, out), with the
# layer-1 weight split into its hidden / input column blocks.
# --------------------------------------------------------------------------- #
def prepare_params(params):
    w1 = jnp.asarray(params["w1"], jnp.float32)        # (H, L+I)
    b1 = jnp.asarray(params["b1"], jnp.float32)        # (H,)
    w2 = jnp.asarray(params["w2"], jnp.float32)        # (L, H)
    b2 = jnp.asarray(params["b2"], jnp.float32)        # (L,)
    L = w2.shape[0]
    return {
        "w1h": jnp.transpose(w1[:, :L]),                # (L, H) hidden part
        "w1x": jnp.transpose(w1[:, L:]),                # (I, H) input part
        "b1":  b1.reshape(1, -1),                       # (1, H)
        "w2s": 0.1 * jnp.transpose(w2),                 # (H, L) 0.1 folded in
        "b2s": 0.1 * b2.reshape(1, -1),                 # (1, L) 0.1 folded in
    }


# --------------------------------------------------------------------------- #
# Fused rollout: apply the cell T times inside a single (gridless) pallas_call.
#   inputs_seq : (T, B, I),  hidden0 : (B, L)  ->  final hidden (B, L)
# --------------------------------------------------------------------------- #
def mlpcell_rollout(inputs_seq, hidden0, prepped):
    T, B, I = inputs_seq.shape
    _, L = hidden0.shape
    if T == 0:                              # edge case: zero steps -> unchanged
        return hidden0.astype(jnp.float32)

    return pl.pallas_call(
        mlpcell_fused_kernel,
        out_shape=jax.ShapeDtypeStruct((B, L), jnp.float32),
        # No grid / BlockSpecs: every operand is tiny and lives whole in VMEM
        # for the duration of the rollout (default whole-array blocks).
    )(hidden0.astype(jnp.float32), inputs_seq.astype(jnp.float32),
      prepped["w1h"], prepped["w1x"], prepped["b1"],
      prepped["w2s"], prepped["b2s"])


# Single-step forward (exactly the PyTorch module's forward): T = 1 rollout.
def mlpcell_forward(inputs, hidden, prepped):
    return mlpcell_rollout(inputs[None], hidden, prepped)


# --------------------------------------------------------------------------- #
# Pure-JAX reference matching the PyTorch module exactly.
# --------------------------------------------------------------------------- #
def mlpcell_reference_step(inputs, hidden, params):
    ih = jnp.concatenate([hidden, inputs], axis=1)
    z1 = ih @ params["w1"].T + params["b1"]
    a1 = jnp.maximum(z1, 0.0)
    vf = a1 @ params["w2"].T + params["b2"]
    return hidden + 0.1 * vf


if __name__ == "__main__":
    # Small shapes consistent with the module's forward.
    B = 8       # batch
    L = 32      # latent / hidden-state size
    I = 16      # input_size
    H = 64      # vf_net hidden width
    T = 16      # number of fused cell steps (rollout demo)

    key = jax.random.PRNGKey(0)
    k_h, k_x, k_w1, k_b1, k_w2, k_b2 = jax.random.split(key, 6)

    hidden = jax.random.normal(k_h, (B, L), dtype=jnp.float32)
    inputs_seq = jax.random.normal(k_x, (T, B, I), dtype=jnp.float32)

    # Deterministic synthetic vf_net parameters (PyTorch Linear layout (out, in)).
    params = {
        "w1": 0.1 * jax.random.normal(k_w1, (H, L + I), dtype=jnp.float32),
        "b1": 0.1 * jax.random.normal(k_b1, (H,), dtype=jnp.float32),
        "w2": 0.1 * jax.random.normal(k_w2, (L, H), dtype=jnp.float32),
        "b2": 0.1 * jax.random.normal(k_b2, (L,), dtype=jnp.float32),
    }
    prepped = prepare_params(params)

    # 1) Single-step forward == the PyTorch module's forward.
    out1 = jax.block_until_ready(mlpcell_forward(inputs_seq[0], hidden, prepped))
    ref1 = mlpcell_reference_step(inputs_seq[0], hidden, params)
    assert out1.shape == (B, L)
    assert jnp.allclose(out1, ref1, atol=1e-5, rtol=1e-5), "single-step mismatch"

    # 2) Fused T-step rollout (one kernel invocation, one HBM writeback).
    outT = jax.block_until_ready(mlpcell_rollout(inputs_seq, hidden, prepped))
    refT = hidden
    for t in range(T):
        refT = mlpcell_reference_step(inputs_seq[t], refT, params)
    assert outT.shape == (B, L)
    assert jnp.allclose(outT, refT, atol=1e-4, rtol=1e-4), "rollout mismatch"

    # 3) T = 0 edge case: hidden passes through unchanged.
    out0 = jax.block_until_ready(
        mlpcell_rollout(jnp.zeros((0, B, I), jnp.float32), hidden, prepped))
    assert jnp.allclose(out0, hidden), "T=0 mismatch"

    print("KERNEL_OK")
</pallas_src>

<mosaic_0001>
module attributes {stable_mosaic.version = 11 : i64} {
  func.func @mlpcell_fused_kernel(%arg0: memref<8x32xf32, #tpu.memory_space<vmem>>, %arg1: memref<1x8x16xf32, #tpu.memory_space<vmem>>, %arg2: memref<32x64xf32, #tpu.memory_space<vmem>>, %arg3: memref<16x64xf32, #tpu.memory_space<vmem>>, %arg4: memref<1x64xf32, #tpu.memory_space<vmem>>, %arg5: memref<64x32xf32, #tpu.memory_space<vmem>>, %arg6: memref<1x32xf32, #tpu.memory_space<vmem>>, %arg7: memref<8x32xf32, #tpu.memory_space<vmem>>) attributes {dimension_semantics = [], scalar_prefetch = 0 : i64, scratch_operands = 0 : i64, tpu.core_type = #tpu.core_type<tc>} {
    %c0 = arith.constant 0 : index
    %c0_0 = arith.constant 0 : index
    %0 = vector.load %arg2[%c0, %c0_0] : memref<32x64xf32, #tpu.memory_space<vmem>>, vector<32x64xf32>
    %c0_1 = arith.constant 0 : index
    %c0_2 = arith.constant 0 : index
    %1 = vector.load %arg3[%c0_1, %c0_2] : memref<16x64xf32, #tpu.memory_space<vmem>>, vector<16x64xf32>
    %c0_3 = arith.constant 0 : index
    %c0_4 = arith.constant 0 : index
    %2 = vector.load %arg4[%c0_3, %c0_4] : memref<1x64xf32, #tpu.memory_space<vmem>>, vector<1x64xf32>
    %c0_5 = arith.constant 0 : index
    %c0_6 = arith.constant 0 : index
    %3 = vector.load %arg5[%c0_5, %c0_6] : memref<64x32xf32, #tpu.memory_space<vmem>>, vector<64x32xf32>
    %c0_7 = arith.constant 0 : index
    %c0_8 = arith.constant 0 : index
    %4 = vector.load %arg6[%c0_7, %c0_8] : memref<1x32xf32, #tpu.memory_space<vmem>>, vector<1x32xf32>
    %c0_9 = arith.constant 0 : index
    %c0_10 = arith.constant 0 : index
    %5 = vector.load %arg0[%c0_9, %c0_10] : memref<8x32xf32, #tpu.memory_space<vmem>>, vector<8x32xf32>
    %c0_11 = arith.constant 0 : index
    %c0_12 = arith.constant 0 : index
    %c0_13 = arith.constant 0 : index
    %6 = vector.load %arg1[%c0_11, %c0_12, %c0_13] : memref<1x8x16xf32, #tpu.memory_space<vmem>>, vector<1x8x16xf32>
    %7 = vector.shape_cast %6 : vector<1x8x16xf32> to vector<8x16xf32>
    %cst = arith.constant dense<0.000000e+00> : vector<8x64xf32>
    %8 = tpu.matmul %5, %0, %cst {dimension_numbers = #tpu.dot_dimension_numbers<[1], [0], [0], [1], [0, 0, 1, 1], [], []>} : vector<8x32xf32>, vector<32x64xf32>, vector<8x64xf32> -> vector<8x64xf32>
    %cst_14 = arith.constant dense<0.000000e+00> : vector<8x64xf32>
    %9 = tpu.matmul %7, %1, %cst_14 {dimension_numbers = #tpu.dot_dimension_numbers<[1], [0], [0], [1], [0, 0, 1, 1], [], []>} : vector<8x16xf32>, vector<16x64xf32>, vector<8x64xf32> -> vector<8x64xf32>
    %10 = arith.addf %8, %9 : vector<8x64xf32>
    %11 = vector.broadcast %2 : vector<1x64xf32> to vector<8x64xf32>
    %12 = arith.addf %10, %11 : vector<8x64xf32>
    %cst_15 = arith.constant 0.000000e+00 : f32
    %13 = vector.broadcast %cst_15 : f32 to vector<8x64xf32>
    %14 = arith.maximumf %12, %13 : vector<8x64xf32>
    %cst_16 = arith.constant dense<0.000000e+00> : vector<8x32xf32>
    %15 = tpu.matmul %14, %3, %cst_16 {dimension_numbers = #tpu.dot_dimension_numbers<[1], [0], [0], [1], [0, 0, 1, 1], [], []>} : vector<8x64xf32>, vector<64x32xf32>, vector<8x32xf32> -> vector<8x32xf32>
    %16 = vector.broadcast %4 : vector<1x32xf32> to vector<8x32xf32>
    %17 = arith.addf %15, %16 : vector<8x32xf32>
    %18 = arith.addf %5, %17 : vector<8x32xf32>
    %c0_17 = arith.constant 0 : index
    %c0_18 = arith.constant 0 : index
    %19 = vector.load %arg7[%c0_17, %c0_18] : memref<8x32xf32, #tpu.memory_space<vmem>>, vector<8x32xf32>
    tpu.vector_store %arg7[%c0_17, %c0_18], %18 {strides = array<i32>} : memref<8x32xf32, #tpu.memory_space<vmem>>, vector<8x32xf32>,
    return
  }
}

</mosaic_0001>

<bundles_post_ra>
// kernel: tpu_custom_call.1
= control target key start
LH: loop header
LB: loop body
LE: loop exit
PB: predicated region body
PF: predicated region fallthrough
CT: control target
= control target key end

     0   :  { %v381_v1 = vmov 0.0   ;;  %vm382_vm0 = vmmov 0   ;;  %vm45_vm1 = vcmask 130048   ;;  %s483_s0 = inlined_call_operand.vmem [shape: f32[8,32], index: 0, kind: input, shape index: {}]   ;;  %s484_s1 = inlined_call_operand.vmem [shape: f32[1,8,16], index: 1, kind: input, shape index: {}]   ;;  %s485_s2 = inlined_call_operand.vmem [shape: f32[32,64], index: 2, kind: input, shape index: {}]   ;;  %s486_s3 = inlined_call_operand.vmem [shape: f32[16,64], index: 3, kind: input, shape index: {}]   ;;  %s487_s4 = inlined_call_operand.vmem [shape: f32[1,64], index: 4, kind: input, shape index: {}]   ;;  %s488_s5 = inlined_call_operand.vmem [shape: f32[64,32], index: 5, kind: input, shape index: {}]   ;;  %s489_s6 = inlined_call_operand.vmem [shape: f32[1,32], index: 6, kind: input, shape index: {}]   ;;  %s490_s7 = inlined_call_operand.hbm [shape: f32[8,32], index: 7, kind: output, shape index: {}]  }
   0x1   :  { %v32_v0 = vld [vmem:[%s486_s3 + $0x8] sm:$0xff]  ;;  %319 = vmatprep.subr.mxu1 %v381_v1  ;;  %v31_v2 = vld [vmem:[%s486_s3] sm:$0xff]  ;;  %323 = vmatprep.mubr.msk.f32.mxu1 %vm382_vm0, %v381_v1 }
   0x2   :  { %320 = vmatpush3.msra.mxu1 %v32_v0  ;;  %v44_v3 = vld [vmem:[%s484_s1] sm:$0xff]  ;;  %337 = vmatprep.subr.mxu0 %v381_v1 }
   0x3   :  { %12 = vsyncpa [#allocation3], 0  ;;  %321 = vmatprep.subr.mxu1 %v381_v1  ;;  %v30_v4 = vld [vmem:[%s485_s2 + $0x18] sm:$0xff]  ;;  %353 = vmatprep.mubr.msk.f32.mxu0 %vm382_vm0, %v381_v1  ;;  %v29_v5 = vld [vmem:[%s485_s2 + $0x10] sm:$0xff]  ;;  %vm119_vm2 = vcmask 261120   ;;  %vm207_vm3 = vcmask 523264  }
   0x4   :  { %322 = vmatpush3.msra.mxu1 %v31_v2  ;;  %v28_v6 = vld [vmem:[%s485_s2 + $0x8] sm:$0xff]  ;;  %v27_v7 = vld [vmem:[%s485_s2] sm:$0xff]  ;;  %v41_v9 = vld [vmem:[%s488_s5 + $0x38] sm:$0xff] }
   0x5   :  { %324 = vmatmul.mubr.msk.f32.vlgmr.msra.gmra.mxu1 %vm45_vm1, %v44_v3  ;;  %326 = vmatprep.subr.mxu1 %v381_v1  ;;  %v43_v8 = vld [vmem:[%s483_s0] sm:$0xff]  ;;  %v40_v10 = vld [vmem:[%s488_s5 + $0x30] sm:$0xff]  ;;  %v39_v11 = vld [vmem:[%s488_s5 + $0x28] sm:$0xff] }
   0x6   :  { %327 = vmatpush3.msra.mxu1 %v30_v4  ;;  %334 = vmatprep.mubr.msk.f32.mxu1 %vm382_vm0, %v381_v1  ;;  %v38_v12 = vld [vmem:[%s488_s5 + $0x20] sm:$0xff]  ;;  %v37_v13 = vld [vmem:[%s488_s5 + $0x18] sm:$0xff]  ;;  %v36_v14 = vld [vmem:[%s488_s5 + $0x10] sm:$0xff] }
   0x7   :  { %328 = vmatprep.subr.mxu1 %v381_v1  ;;  %338 = vmatpush3.msra.mxu0 %v41_v9  ;;  %v35_v15 = vld [vmem:[%s488_s5 + $0x8] sm:$0xff]  ;;  %v34_v16 = vld [vmem:[%s488_s5] sm:$0xff]  ;;  %s383_s5 = smov [#allocation2]  }
   0x8   :  { %329 = vmatpush3.msra.mxu1 %v29_v5  ;;  %339 = vmatprep.subr.mxu0 %v381_v1  ;;  %v299_v19 = vld [vmem:[%s487_s4] ss:$0 sm:$0xff]  ;;  %s289_s9 = sshll.u32 %s383_s5, 4  ;;  %s290_s9 = int_to_ptr.vmem [resolvable:$true] %s289_s9 }
   0x9   :  { %330 = vmatprep.subr.mxu1 %v381_v1  ;;  %340 = vmatpush3.msra.mxu0 %v40_v10  ;;  %v300_v25 = vld [vmem:[%s489_s6] ss:$0 sm:$0xff]  ;;  %s359_s4 = scalar_lea.vmem %s290_s9, 128  ;;  %p364_p1 = scmp.lt.s32.totalorder %s290_s9, %s290_s9 }
   0xa   :  { %331 = vmatpush3.msra.mxu1 %v28_v6  ;;  %341 = vmatprep.subr.mxu0 %v381_v1  ;;  %p360_p0 = scmp.ne.s32.totalorder %s290_s9, %s359_s4  ;;  %p365_p2 = scmp.lt.s32.totalorder %s359_s4, %s359_s4 }
   0xb   :  { %332 = vmatprep.subr.mxu1 %v381_v1  ;;  %342 = vmatpush3.msra.mxu0 %v39_v11 }
   0xc   :  { %333 = vmatpush3.msra.mxu1 %v27_v7  ;;  %343 = vmatprep.subr.mxu0 %v381_v1  ;;  %p366_p3 = por %p365_p2, %p364_p1 }
   0xd   :  { %335 = vmatmul.mubr.msk.f32.vlgmr.msra.gmra.mxu1 %vm119_vm2, %v43_v8  ;;  %344 = vmatpush3.msra.mxu0 %v38_v12 }
   0xe   :  { %345 = vmatprep.subr.mxu0 %v381_v1  ;;  %p367_p4 = pnand %p366_p3, %p360_p0 }
   0xf   :  { %346 = vmatpush3.msra.mxu0 %v37_v13 }
  0x10   :  { %347 = vmatprep.subr.mxu0 %v381_v1 }
  0x11   :  { %348 = vmatpush3.msra.mxu0 %v36_v14 }
  0x12   :  { %349 = vmatprep.subr.mxu0 %v381_v1 }
  0x13   :  { %350 = vmatpush3.msra.mxu0 %v35_v15 }
  0x14   :  { %351 = vmatprep.subr.mxu0 %v381_v1 }
  0x15   :  { %352 = vmatpush3.msra.mxu0 %v34_v16 }
  0xc5   :  { %v115_v17 = vpop.f32.mrf.mxu1 }
  0xc7   :  { %v325_v18 = vpop.f32.mrf.mxu1 }
  0xcd   :  { %v189_v20 = vpop.f32.mrf.mxu1 }
  0xce   :  { %v190_v21 = vadd.f32 %v189_v20, %v115_v17 }
  0xcf   :  { %v336_v22 = vpop.f32.mrf.mxu1 }
  0xd0   :  { %v199_v23 = vadd.f32 %v299_v19, %v190_v21 }
  0xd2   :  { %v200_v24 = vmax.f32 %v199_v23, 0.0 }
  0xd4   :  { %354 = vmatmul.mubr.msk.f32.vlgmr.msra.gmra.mxu0 %vm207_vm3, %v200_v24 }
 0x194   :  { %v277_v26 = vpop.f32.mrf.mxu0 }
 0x195   :  { %v278_v27 = vadd.f32 %v300_v25, %v277_v26 }
 0x196   :  { %v355_v28 = vpop.f32.mrf.mxu0 }
 0x197   :  { %v281_v29 = vadd.f32 %v278_v27, %v43_v8 }
 0x199   :  { %282 = vst.msk [vmem:[#allocation2] sm:$0xff] %vm119_vm2, %v281_v29 }
 0x19a   :  { %370 = shalt.err (!%p367_p4)
}
 0x19b   :  { %292 = dma.vmem_to_hbm [thread:$0]  %s290_s9, 128, %s490_s7, [#allocation3]  }
 0x19c   :  { %379 = dma.done.wait [#allocation3], 128  }
 0x19d   :  { %380 = vsyncadd [#allocation3], 4294967168 }
 0x19e   :  { %296 = vsyncpa [#allocation3], 1 }

</bundles_post_ra>
